<compile_context>
chip_gen: v6e
topology: v6e:2x2x1
jax: 0.10.0
libtpu: 0.0.40
codegen_flags: <defaults>
</compile_context>

<pallas_src>
import jax
import jax.numpy as jnp
from jax.experimental import pallas as pl
from jax.experimental.pallas import tpu as pltpu

LN_EPS = 1e-5


def _round_up(x, m):
    return (x + m - 1) // m * m


def _vmem_capacity_bytes():
    try:
        return int(pltpu.get_tpu_info().vmem_capacity_bytes)
    except Exception:
        return 64 << 20   # conservative (v7x-sized) fallback


def _pick_tile_rows(rows, per_row_bytes, fixed_bytes, budget_bytes):
    """Largest row tile that fits the VMEM budget; >=2 grid steps once rows>=256."""
    avail = budget_bytes - fixed_bytes
    max_rows = max(avail // max(per_row_bytes, 1), 128)
    if rows < 256 and rows <= max_rows:
        return rows                                   # single exact block, no padding
    tile = min(int(max_rows), 2048, _round_up(rows, 128))
    if rows >= 256:                                   # keep >=2 parallel steps (2 TCs)
        tile = min(tile, max(((rows // 2) // 128) * 128, 128))
    return max((tile // 128) * 128, 128)


def _kernel_small_v(h_ref, wf_ref, cb_ref, o_ref):
    """V < 128: lane-dense (V, TR) output; full LayerNorm then contraction.

    h_ref : (TR, D)  hidden rows          wf_ref: (V, D) gamma-folded weight (f32)
    cb_ref: (V, 1)   beta-folded bias     o_ref : (V, TR) logits
    """
    h = h_ref[...].astype(jnp.float32)
    mean = jnp.mean(h, axis=-1, keepdims=True)
    c = h - mean
    var = jnp.mean(c * c, axis=-1, keepdims=True)
    normed = c * jax.lax.rsqrt(var + LN_EPS)                     # (TR, D)
    logits = jax.lax.dot_general(
        wf_ref[...], normed,
        dimension_numbers=(((1,), (1,)), ((), ())),
        preferred_element_type=jnp.float32)                      # (V, TR)
    o_ref[...] = (logits + cb_ref[...]).astype(o_ref.dtype)


def _kernel_large_v(h_ref, wf_ref, wsum_ref, cb_ref, o_ref):
    """V >= 128: (TR, V) output; LayerNorm hoisted out of the MXU operand.

    h_ref  : (TR, D) hidden rows (native dtype, fed to the MXU directly)
    wf_ref : (V, D)  gamma-folded weight (hidden's MXU dtype)
    wsum_ref: (1, V) row sums of the folded weight (f32)
    cb_ref : (1, V)  beta-folded bias (f32)
    o_ref  : (TR, V) logits
    """
    h_raw = h_ref[...]
    h = h_raw.astype(jnp.float32)
    mean = jnp.mean(h, axis=-1, keepdims=True)                   # (TR, 1)
    c = h - mean
    var = jnp.mean(c * c, axis=-1, keepdims=True)
    rstd = jax.lax.rsqrt(var + LN_EPS)                           # (TR, 1)
    raw = jax.lax.dot_general(
        h_raw, wf_ref[...],
        dimension_numbers=(((1,), (1,)), ((), ())),
        preferred_element_type=jnp.float32)                      # (TR, V)
    o_ref[...] = (rstd * (raw - mean * wsum_ref[...])
                  + cb_ref[...]).astype(o_ref.dtype)


def lnfinal_classifier(hidden, ln_g, ln_b, cls_w, cls_b, *,
                       tile_rows=None, out_dtype=jnp.float32):
    """hidden: (B, S, D) -> logits (B, S, V).

    ln_g, ln_b : (D,)   ln_final weight / bias
    cls_w      : (V, D) classifier weight (torch layout)
    cls_b      : (V,)   classifier bias
    """
    B, S, D = hidden.shape
    V = cls_w.shape[0]
    rows = B * S
    small_v = V < 128
    f32 = jnp.float32

    # One-time param prep (outside the kernel): fold gamma into W, beta into b.
    w32 = cls_w.astype(f32)
    w_fold = w32 * ln_g.astype(f32).reshape(1, D)                     # (V, D)
    cb = cls_b.astype(f32).reshape(V) + w32 @ ln_b.astype(f32)        # (V,)

    in_dt = hidden.dtype
    mxu_dt = jnp.bfloat16 if in_dt == jnp.bfloat16 else f32
    in_item = jnp.dtype(in_dt).itemsize
    out_item = jnp.dtype(out_dtype).itemsize

    if small_v:
        wf = w_fold                                                    # f32 (V, D)
        cbk = cb.reshape(V, 1)
        wsum = None
    else:
        wf = w_fold.astype(mxu_dt)                                     # MXU dtype
        wsum = jnp.sum(w_fold, axis=1).reshape(1, V)                   # f32
        cbk = cb.reshape(1, V)
    w_item = jnp.dtype(wf.dtype).itemsize

    # VMEM accounting: double-buffered in/out tiles, f32 LN intermediates, and
    # the resident folded weight (counted double-buffered to stay conservative).
    interm = 3 if small_v else 2
    per_row = (2 * D * in_item + interm * D * 4 + 2 * V * out_item
               + (0 if small_v else V * 4))
    fixed = 2 * V * D * w_item + 8 * V * 4 + (2 << 20)
    cap = _vmem_capacity_bytes()
    budget = (cap * 3) // 4

    if tile_rows is None:
        tile_rows = _pick_tile_rows(rows, per_row, fixed, budget)
    else:
        tile_rows = int(tile_rows)
        tile_rows = rows if tile_rows >= rows else max((tile_rows // 128) * 128, 128)

    grid = pl.cdiv(rows, tile_rows)
    need = fixed + tile_rows * per_row
    vmem_limit = int(min(cap, max(need + need // 4, 32 << 20)))

    h2d = hidden.reshape(rows, D)                                      # no pad, no copy

    def run(single_buffer_consts):
        def cspec(shape):
            if single_buffer_consts:
                return pl.BlockSpec(shape, lambda i: (0, 0),
                                    pipeline_mode=pl.Buffered(1))
            return pl.BlockSpec(shape, lambda i: (0, 0))

        h_spec = pl.BlockSpec((tile_rows, D), lambda i: (i, 0))
        if small_v:
            kernel = _kernel_small_v
            operands = (h2d, wf, cbk)
            in_specs = [h_spec, cspec((V, D)), cspec((V, 1))]
            out_specs = pl.BlockSpec((V, tile_rows), lambda i: (0, i))
            out_shape = jax.ShapeDtypeStruct((V, rows), out_dtype)
        else:
            kernel = _kernel_large_v
            operands = (h2d, wf, wsum, cbk)
            in_specs = [h_spec, cspec((V, D)), cspec((1, V)), cspec((1, V))]
            out_specs = pl.BlockSpec((tile_rows, V), lambda i: (i, 0))
            out_shape = jax.ShapeDtypeStruct((rows, V), out_dtype)

        return pl.pallas_call(
            kernel,
            out_shape=out_shape,
            grid_spec=pltpu.PrefetchScalarGridSpec(
                num_scalar_prefetch=0,
                grid=(grid,),
                in_specs=in_specs,
                out_specs=out_specs),
            compiler_params=pltpu.CompilerParams(
                dimension_semantics=("parallel",),
                vmem_limit_bytes=vmem_limit),
        )(*operands)

    # Single-buffer the constant (weight/bias) operands when the grid has more
    # than one step; fall back to plain double-buffered specs if unsupported.
    try:
        out = run(single_buffer_consts=(grid > 1))
    except Exception:
        out = run(single_buffer_consts=False)

    if small_v:
        return out.T.reshape(B, S, V)      # (V, rows) -> (rows, V); free for V == 1
    return out.reshape(B, S, V)


def reference(hidden, ln_g, ln_b, cls_w, cls_b):
    """Pure-JAX reference: full LayerNorm (gamma/beta) then Linear."""
    h = hidden.astype(jnp.float32)
    mean = jnp.mean(h, axis=-1, keepdims=True)
    c = h - mean
    var = jnp.mean(c * c, axis=-1, keepdims=True)
    normed = (c * jax.lax.rsqrt(var + LN_EPS) * ln_g.reshape(1, 1, -1)
              + ln_b.reshape(1, 1, -1))
    return jnp.einsum("bsd,vd->bsv", normed, cls_w) + cls_b.reshape(1, 1, -1)


if __name__ == "__main__":
    batch, seq = 2, 8
    d_model, tgt_vocab, vocab_in = 128, 1, 64

    key = jax.random.PRNGKey(0)
    k_tok, k_emb, k_g, k_b, k_w, k_cb, k_tok2, k_w2, k_cb2 = jax.random.split(key, 9)

    # Deterministic synthetic parameters.
    embed = jax.random.normal(k_emb, (vocab_in, d_model), jnp.float32) * 0.02
    ln_g = 1.0 + 0.1 * jax.random.normal(k_g, (d_model,), jnp.float32)
    ln_b = 0.1 * jax.random.normal(k_b, (d_model,), jnp.float32)
    bound = 1.0 / (d_model ** 0.5)
    cls_w = jax.random.uniform(k_w, (tgt_vocab, d_model), jnp.float32,
                               minval=-bound, maxval=bound)
    cls_b = jax.random.uniform(k_cb, (tgt_vocab,), jnp.float32,
                               minval=-bound, maxval=bound)

    # Token input x (what Model.forward receives) and synthetic "base" hidden.
    x = jax.random.randint(k_tok, (batch, seq), 0, vocab_in, jnp.int32)
    hidden = embed[x]                                   # (B, S, D) base stand-in

    # 1) Module-shaped case (V=1), single exact block.
    logits = jax.block_until_ready(
        lnfinal_classifier(hidden, ln_g, ln_b, cls_w, cls_b))
    ref = reference(hidden, ln_g, ln_b, cls_w, cls_b)
    assert logits.shape == (batch, seq, tgt_vocab)
    assert jnp.allclose(logits, ref, atol=1e-4, rtol=1e-4)

    # 2) Multi-tile ragged grid (rows=272 not a multiple of the 128-row tile).
    x2 = jax.random.randint(k_tok2, (batch, 136), 0, vocab_in, jnp.int32)
    hidden2 = embed[x2]
    logits2 = jax.block_until_ready(
        lnfinal_classifier(hidden2, ln_g, ln_b, cls_w, cls_b, tile_rows=128))
    ref2 = reference(hidden2, ln_g, ln_b, cls_w, cls_b)
    assert jnp.allclose(logits2, ref2, atol=1e-4, rtol=1e-4)

    # 3) Large-vocab path (V>=128): hoisted-LN (TR, V) kernel, f32 hidden.
    V2 = 256
    cls_w2 = jax.random.uniform(k_w2, (V2, d_model), jnp.float32,
                                minval=-bound, maxval=bound)
    cls_b2 = jax.random.uniform(k_cb2, (V2,), jnp.float32,
                                minval=-bound, maxval=bound)
    logits3 = jax.block_until_ready(
        lnfinal_classifier(hidden2, ln_g, ln_b, cls_w2, cls_b2))
    ref3 = reference(hidden2, ln_g, ln_b, cls_w2, cls_b2)
    assert logits3.shape == (batch, 136, V2)
    assert jnp.allclose(logits3, ref3, atol=2e-4, rtol=2e-4)

    # 4) Same path with bf16 hidden: MXU consumes bf16 directly (looser tol).
    hidden2_bf16 = hidden2.astype(jnp.bfloat16)
    logits4 = jax.block_until_ready(
        lnfinal_classifier(hidden2_bf16, ln_g, ln_b, cls_w2, cls_b2))
    ref4 = reference(hidden2_bf16, ln_g, ln_b, cls_w2, cls_b2)
    assert jnp.allclose(logits4, ref4, atol=5e-2, rtol=5e-2)

    print("KERNEL_OK")
</pallas_src>

<mosaic_0001>
module attributes {stable_mosaic.version = 11 : i64} {
  func.func @_kernel_small_v(%arg0: i32, %arg1: memref<16x128xf32, #tpu.memory_space<vmem>>, %arg2: memref<1x128xf32, #tpu.memory_space<vmem>>, %arg3: memref<1x1xf32, #tpu.memory_space<vmem>>, %arg4: memref<1x16xf32, #tpu.memory_space<vmem>>) attributes {dimension_semantics = [#tpu.dimension_semantics<parallel>], iteration_bounds = array<i64: 1>, scalar_prefetch = 0 : i64, scratch_operands = 0 : i64, tpu.core_type = #tpu.core_type<tc>, window_params = [{transform_indices = @transform_0, window_bounds = array<i64: 16, 128>}, {pipeline_mode = #tpu.pipeline_mode<synchronous>, transform_indices = @transform_1, window_bounds = array<i64: 1, 128>}, {pipeline_mode = #tpu.pipeline_mode<synchronous>, transform_indices = @transform_2, window_bounds = array<i64: 1, 1>}, {transform_indices = @transform_3, window_bounds = array<i64: 1, 16>}]} {
    %c0 = arith.constant 0 : index
    %c0_0 = arith.constant 0 : index
    %0 = vector.load %arg1[%c0, %c0_0] : memref<16x128xf32, #tpu.memory_space<vmem>>, vector<16x128xf32>
    %cst = arith.constant dense<0.000000e+00> : vector<16xf32>
    %1 = vector.multi_reduction <add>, %0, %cst [1] : vector<16x128xf32> to vector<16xf32>
    %2 = vector.shape_cast %1 : vector<16xf32> to vector<16x1xf32>
    %cst_1 = arith.constant 1.280000e+02 : f32
    %3 = vector.broadcast %cst_1 : f32 to vector<16x1xf32>
    %4 = arith.divf %2, %3 : vector<16x1xf32>
    %5 = vector.broadcast %4 : vector<16x1xf32> to vector<16x128xf32>
    %6 = arith.subf %0, %5 : vector<16x128xf32>
    %7 = arith.mulf %6, %6 : vector<16x128xf32>
    %cst_2 = arith.constant dense<0.000000e+00> : vector<16xf32>
    %8 = vector.multi_reduction <add>, %7, %cst_2 [1] : vector<16x128xf32> to vector<16xf32>
    %9 = vector.shape_cast %8 : vector<16xf32> to vector<16x1xf32>
    %cst_3 = arith.constant 1.280000e+02 : f32
    %10 = vector.broadcast %cst_3 : f32 to vector<16x1xf32>
    %11 = arith.divf %9, %10 : vector<16x1xf32>
    %cst_4 = arith.constant 9.99999974E-6 : f32
    %12 = vector.broadcast %cst_4 : f32 to vector<16x1xf32>
    %13 = arith.addf %11, %12 : vector<16x1xf32>
    %14 = math.rsqrt %13 : vector<16x1xf32>
    %15 = vector.broadcast %14 : vector<16x1xf32> to vector<16x128xf32>
    %16 = arith.mulf %6, %15 : vector<16x128xf32>
    %c0_5 = arith.constant 0 : index
    %c0_6 = arith.constant 0 : index
    %17 = vector.load %arg2[%c0_5, %c0_6] : memref<1x128xf32, #tpu.memory_space<vmem>>, vector<1x128xf32>
    %cst_7 = arith.constant dense<0.000000e+00> : vector<1x16xf32>
    %18 = tpu.matmul %17, %16, %cst_7 {dimension_numbers = #tpu.dot_dimension_numbers<[1], [1], [0], [0], [0, 0, 1, 0], [], []>} : vector<1x128xf32>, vector<16x128xf32>, vector<1x16xf32> -> vector<1x16xf32>
    %c0_8 = arith.constant 0 : index
    %c0_9 = arith.constant 0 : index
    %19 = vector.load %arg3[%c0_8, %c0_9] : memref<1x1xf32, #tpu.memory_space<vmem>>, vector<1x1xf32>
    %20 = vector.broadcast %19 : vector<1x1xf32> to vector<1x16xf32>
    %21 = arith.addf %18, %20 : vector<1x16xf32>
    %c0_10 = arith.constant 0 : index
    %c0_11 = arith.constant 0 : index
    %22 = vector.load %arg4[%c0_10, %c0_11] : memref<1x16xf32, #tpu.memory_space<vmem>>, vector<1x16xf32>
    tpu.vector_store %arg4[%c0_10, %c0_11], %21 {strides = array<i32>} : memref<1x16xf32, #tpu.memory_space<vmem>>, vector<1x16xf32>,
    return
  }
  func.func @transform_0(%arg0: i32) -> (i32, i32) {
    %c0_i32 = arith.constant 0 : i32
    %c0_i32_0 = arith.constant 0 : i32
    return %arg0, %c0_i32 : i32, i32
  }
  func.func @transform_1(%arg0: i32) -> (i32, i32) {
    %c0_i32 = arith.constant 0 : i32
    %c0_i32_0 = arith.constant 0 : i32
    %c0_i32_1 = arith.constant 0 : i32
    return %c0_i32, %c0_i32_0 : i32, i32
  }
  func.func @transform_2(%arg0: i32) -> (i32, i32) {
    %c0_i32 = arith.constant 0 : i32
    %c0_i32_0 = arith.constant 0 : i32
    %c0_i32_1 = arith.constant 0 : i32
    return %c0_i32, %c0_i32_0 : i32, i32
  }
  func.func @transform_3(%arg0: i32) -> (i32, i32) {
    %c0_i32 = arith.constant 0 : i32
    %c0_i32_0 = arith.constant 0 : i32
    return %c0_i32, %arg0 : i32, i32
  }
}

module attributes {stable_mosaic.version = 11 : i64} {
  func.func @_kernel_small_v(%arg0: i32, %arg1: memref<16x128xf32, #tpu.memory_space<vmem>>, %arg2: memref<1x128xf32, #tpu.memory_space<vmem>>, %arg3: memref<1x1xf32, #tpu.memory_space<vmem>>, %arg4: memref<1x16xf32, #tpu.memory_space<vmem>>) attributes {dimension_semantics = [#tpu.dimension_semantics<parallel>], iteration_bounds = array<i64: 1>, scalar_prefetch = 0 : i64, scratch_operands = 0 : i64, tpu.core_type = #tpu.core_type<tc>, window_params = [{transform_indices = @transform_0, window_bounds = array<i64: 16, 128>}, {pipeline_mode = #tpu.pipeline_mode<synchronous>, transform_indices = @transform_1, window_bounds = array<i64: 1, 128>}, {pipeline_mode = #tpu.pipeline_mode<synchronous>, transform_indices = @transform_2, window_bounds = array<i64: 1, 1>}, {transform_indices = @transform_3, window_bounds = array<i64: 1, 16>}]} {
    %c0 = arith.constant 0 : index
    %c0_0 = arith.constant 0 : index
    %0 = vector.load %arg1[%c0, %c0_0] : memref<16x128xf32, #tpu.memory_space<vmem>>, vector<16x128xf32>
    %cst = arith.constant dense<0.000000e+00> : vector<16xf32>
    %1 = vector.multi_reduction <add>, %0, %cst [1] : vector<16x128xf32> to vector<16xf32>
    %2 = vector.shape_cast %1 : vector<16xf32> to vector<16x1xf32>
    %cst_1 = arith.constant 1.280000e+02 : f32
    %3 = vector.broadcast %cst_1 : f32 to vector<16x1xf32>
    %4 = arith.divf %2, %3 : vector<16x1xf32>
    %5 = vector.broadcast %4 : vector<16x1xf32> to vector<16x128xf32>
    %6 = arith.subf %0, %5 : vector<16x128xf32>
    %7 = arith.mulf %6, %6 : vector<16x128xf32>
    %cst_2 = arith.constant dense<0.000000e+00> : vector<16xf32>
    %8 = vector.multi_reduction <add>, %7, %cst_2 [1] : vector<16x128xf32> to vector<16xf32>
    %9 = vector.shape_cast %8 : vector<16xf32> to vector<16x1xf32>
    %cst_3 = arith.constant 1.280000e+02 : f32
    %10 = vector.broadcast %cst_3 : f32 to vector<16x1xf32>
    %11 = arith.divf %9, %10 : vector<16x1xf32>
    %cst_4 = arith.constant 9.99999974E-6 : f32
    %12 = vector.broadcast %cst_4 : f32 to vector<16x1xf32>
    %13 = arith.addf %11, %12 : vector<16x1xf32>
    %14 = math.rsqrt %13 : vector<16x1xf32>
    %15 = vector.broadcast %14 : vector<16x1xf32> to vector<16x128xf32>
    %16 = arith.mulf %6, %15 : vector<16x128xf32>
    %c0_5 = arith.constant 0 : index
    %c0_6 = arith.constant 0 : index
    %17 = vector.load %arg2[%c0_5, %c0_6] : memref<1x128xf32, #tpu.memory_space<vmem>>, vector<1x128xf32>
    %cst_7 = arith.constant dense<0.000000e+00> : vector<1x16xf32>
    %18 = tpu.matmul %17, %16, %cst_7 {dimension_numbers = #tpu.dot_dimension_numbers<[1], [1], [0], [0], [0, 0, 1, 0], [], []>} : vector<1x128xf32>, vector<16x128xf32>, vector<1x16xf32> -> vector<1x16xf32>
    %c0_8 = arith.constant 0 : index
    %c0_9 = arith.constant 0 : index
    %19 = vector.load %arg3[%c0_8, %c0_9] : memref<1x1xf32, #tpu.memory_space<vmem>>, vector<1x1xf32>
    %20 = vector.broadcast %19 : vector<1x1xf32> to vector<1x16xf32>
    %21 = arith.addf %18, %20 : vector<1x16xf32>
    %c0_10 = arith.constant 0 : index
    %c0_11 = arith.constant 0 : index
    %22 = vector.load %arg4[%c0_10, %c0_11] : memref<1x16xf32, #tpu.memory_space<vmem>>, vector<1x16xf32>
    tpu.vector_store %arg4[%c0_10, %c0_11], %21 {strides = array<i32>} : memref<1x16xf32, #tpu.memory_space<vmem>>, vector<1x16xf32>,
    return
  }
  func.func @transform_0(%arg0: i32) -> (i32, i32) {
    %c0_i32 = arith.constant 0 : i32
    %c0_i32_0 = arith.constant 0 : i32
    return %arg0, %c0_i32 : i32, i32
  }
  func.func @transform_1(%arg0: i32) -> (i32, i32) {
    %c0_i32 = arith.constant 0 : i32
    %c0_i32_0 = arith.constant 0 : i32
    %c0_i32_1 = arith.constant 0 : i32
    return %c0_i32, %c0_i32_0 : i32, i32
  }
  func.func @transform_2(%arg0: i32) -> (i32, i32) {
    %c0_i32 = arith.constant 0 : i32
    %c0_i32_0 = arith.constant 0 : i32
    %c0_i32_1 = arith.constant 0 : i32
    return %c0_i32, %c0_i32_0 : i32, i32
  }
  func.func @transform_3(%arg0: i32) -> (i32, i32) {
    %c0_i32 = arith.constant 0 : i32
    %c0_i32_0 = arith.constant 0 : i32
    return %c0_i32, %arg0 : i32, i32
  }
}

</mosaic_0001>

<bundles_post_ra>
// kernel: tpu_custom_call.1
= control target key start
LH: loop header
LB: loop body
LE: loop exit
PB: predicated region body
PF: predicated region fallthrough
CT: control target
= control target key end

     0   :  { %s259_s0 = inlined_call_operand.hbm [shape: f32[16,128], index: 0, kind: input, shape index: {}]   ;;  %s260_s1 = inlined_call_operand.vmem [shape: f32[1,128], index: 1, kind: input, shape index: {}]   ;;  %s261_s2 = inlined_call_operand.<no memory space> [shape: f32[1,1], index: 2, kind: input, shape index: {}]   ;;  %s262_s3 = inlined_call_operand.hbm [shape: f32[1,16], index: 3, kind: output, shape index: {}]  }
   0x1   :  { %v8_v0 = vstv %s261_s2 }
   0x2   :  { %9 = vst [vmem:[#allocation2] sm:$0x1] %v8_v0 }
   0x3   :  { %10 = vsyncpa [#allocation4], 0 }
   0x4   :  { %11 = vsyncpa [#allocation5], 0  ;;  %s220_s14 = smov [#allocation3]  }
   0x5   :  { %s17_s15 = sshll.u32 %s220_s14, 4  ;;  %s18_s15 = int_to_ptr.vmem [resolvable:$true] %s17_s15 }
   0x6   :  { %s184_s16 = scalar_lea.vmem %s18_s15, 256  ;;  %p189_p1 = scmp.lt.s32.totalorder %s18_s15, %s18_s15 }
   0x7   :  { %p185_p0 = scmp.ne.s32.totalorder %s18_s15, %s184_s16  ;;  %p190_p2 = scmp.lt.s32.totalorder %s184_s16, %s184_s16 }
   0x9   :  { %p191_p3 = por %p190_p2, %p189_p1 }
   0xb   :  { %p192_p4 = pnand %p191_p3, %p185_p0 }
   0xd   :  { %195 = shalt.err (!%p192_p4)
}
   0xe   :  { %s221_s17 = smov 128   ;;  %s222_s18 = smov 8  }
   0xf   :  { %23 = dma.hbm_to_vmem [thread:$0]  %s259_s0, 256, %s18_s15, [#allocation4], %s221_s17, %s221_s17, %s222_s18  }
  0x10   :  { %216 = dma.done.wait [#allocation4], 256  }
  0x11   :  { %217 = vsyncadd [#allocation4], 4294967040  ;;  %v32_v1 = vld [vmem:[#allocation3 + $0x8] sm:$0xff]  ;;  %v31_v2 = vld [vmem:[#allocation3] sm:$0xff]  ;;  %v223_v11 = vmov 0.0   ;;  %vm224_vm0 = vmmov 0   ;;  %v63_v25 = vlaneseq }
  0x12   :  { %35 = vadd.xlane.f32.xlu0 %v32_v1  ;;  %157 = vmatprep.subr.mxu0 %v223_v11  ;;  %v57_v12 = vld [vmem:[#allocation2] sm:$0x1]  ;;  %v225_v13 = vmov 0   ;;  %s226_s21 = smov [#allocation6]   ;;  %vm137_vm1 = vcmask 122880  }
  0x13   :  { %161 = vmatprep.mubr.msk.f32.mxu0 %vm224_vm0, %v223_v11  ;;  %171 = vset.pattern.permute.xlu0 %v225_v13  ;;  %v56_v24 = vld [vmem:[%s260_s1] sm:$0x1]  ;;  %v64_v26 = vshrl.u32 %v63_v25, 7  ;;  %s145_s22 = sshll.u32 %s226_s21, 4  ;;  %s146_s22 = int_to_ptr.vmem [resolvable:$true] %s145_s22 }
  0x14   :  { %s196_s23 = scalar_lea.vmem %s146_s22, 16  ;;  %s200_s24 = scalar_lea.vmem %s146_s22, 32 }
  0x15   :  { %v65_v27 = vsub.s32 0, %v64_v26  ;;  %p197_p5 = scmp.ne.s32.totalorder %s146_s22, %s196_s23  ;;  %p201_p6 = scmp.lt.s32.totalorder %s146_s22, %s146_s22 }
  0x16   :  { %33 = vadd.xlane.f32.xlu0 %v31_v2  ;;  %p202_p7 = scmp.lt.s32.totalorder %s200_s24, %s196_s23 }
  0x18   :  { %p203_p8 = por %p202_p7, %p201_p6 }
  0x1a   :  { %p204_p9 = pnand %p203_p8, %p197_p5 }
  0x2c   :  { %60 = vperm.xlu0 %171, %v57_v12  }
  0x9b   :  { %v36_v3 = vpop.xlane.xlu0 %35 }
  0x9c   :  { %v39_v4 = vmul.f32 0.0078125, %v36_v3 }
  0x9e   :  { %v41_v5 = vsub.f32 %v32_v1, %v39_v4 }
  0x9f   :  { %v34_v6 = vpop.xlane.xlu0 %33 }
  0xa0   :  { %v38_v7 = vmul.f32 0.0078125, %v34_v6  ;;  %v43_v8 = vmul.f32 %v41_v5, %v41_v5 }
  0xa2   :  { %v40_v9 = vsub.f32 %v31_v2, %v38_v7  ;;  %46 = vadd.xlane.f32.xlu1 %v43_v8 }
  0xa4   :  { %v42_v10 = vmul.f32 %v40_v9, %v40_v9 }
  0xa6   :  { %44 = vadd.xlane.f32.xlu1 %v42_v10 }
  0xa7   :  { %v61_v28 = vpop.permute.xlu0 %60 }
  0xa8   :  { %v66_v29 = vrot.slane %v61_v28, %v65_v27 }
 0x12b   :  { %v47_v14 = vpop.xlane.xlu1 %46 }
 0x12c   :  { %v49_v15 = vmul.f32 0.0078125, %v47_v14 }
 0x12e   :  { %v51_v16 = vadd.f32 1e-05, %v49_v15 }
 0x12f   :  { %v45_v17 = vpop.xlane.xlu1 %44 }
 0x130   :  { %172 = vrsqrt.f32 %v51_v16  ;;  %v48_v18 = vmul.f32 0.0078125, %v45_v17 }
 0x132   :  { %v50_v19 = vadd.f32 1e-05, %v48_v18 }
 0x134   :  { %174 = vrsqrt.f32 %v50_v19 }
 0x13d   :  { %v173_v20 = vpop.eup %172 }
 0x13e   :  { %v55_v21 = vmul.f32 %v173_v20, %v41_v5 }
 0x140   :  { %158 = vmatpush3.xpose.msra.mxu0 %v55_v21 }
 0x141   :  { %v175_v22 = vpop.eup %174  ;;  %159 = vmatprep.subr.mxu0 %v223_v11 }
 0x142   :  { %v54_v23 = vmul.f32 %v175_v22, %v40_v9 }
 0x144   :  { %160 = vmatpush3.xpose.msra.mxu0 %v54_v23 }
 0x147   :  { %162 = vmatmul.mubr.f32.vlgmr.msra.gmra.mxu0 %v56_v24 }
 0x207   :  { %v133_v30 = vpop.f32.mrf.mxu0 }
 0x208   :  { %v134_v31 = vadd.f32 %v133_v30, %v66_v29 }
 0x209   :  { %v163_v32 = vpop.f32.mrf.mxu0 }
 0x20a   :  { %138 = vst.msk [vmem:[#allocation6] sm:$0x1] %vm137_vm1, %v134_v31 }
 0x20b   :  { %207 = shalt.err (!%p204_p9)
}
 0x20c   :  { %148 = dma.vmem_to_hbm [thread:$0]  %s146_s22, 16, %s262_s3, [#allocation5]  }
 0x20d   :  { %218 = dma.done.wait [#allocation5], 16  }
 0x20e   :  { %219 = vsyncadd [#allocation5], 4294967280 }
 0x20f   :  { %152 = vsyncpa [#allocation4], 1 }
 0x210   :  { %153 = vsyncpa [#allocation5], 1 }

// kernel: tpu_custom_call.1
= control target key start
LH: loop header
LB: loop body
LE: loop exit
PB: predicated region body
PF: predicated region fallthrough
CT: control target
= control target key end

     0   :  { %s259_s0 = inlined_call_operand.hbm [shape: f32[16,128], index: 0, kind: input, shape index: {}]   ;;  %s260_s1 = inlined_call_operand.vmem [shape: f32[1,128], index: 1, kind: input, shape index: {}]   ;;  %s261_s2 = inlined_call_operand.<no memory space> [shape: f32[1,1], index: 2, kind: input, shape index: {}]   ;;  %s262_s3 = inlined_call_operand.hbm [shape: f32[1,16], index: 3, kind: output, shape index: {}]  }
   0x1   :  { %v8_v0 = vstv %s261_s2 }
   0x2   :  { %9 = vst [vmem:[#allocation2] sm:$0x1] %v8_v0 }
   0x3   :  { %10 = vsyncpa [#allocation4], 0 }
   0x4   :  { %11 = vsyncpa [#allocation5], 0  ;;  %s220_s14 = smov [#allocation3]  }
   0x5   :  { %s17_s15 = sshll.u32 %s220_s14, 4  ;;  %s18_s15 = int_to_ptr.vmem [resolvable:$true] %s17_s15 }
   0x6   :  { %s184_s16 = scalar_lea.vmem %s18_s15, 256  ;;  %p189_p1 = scmp.lt.s32.totalorder %s18_s15, %s18_s15 }
   0x7   :  { %p185_p0 = scmp.ne.s32.totalorder %s18_s15, %s184_s16  ;;  %p190_p2 = scmp.lt.s32.totalorder %s184_s16, %s184_s16 }
   0x9   :  { %p191_p3 = por %p190_p2, %p189_p1 }
   0xb   :  { %p192_p4 = pnand %p191_p3, %p185_p0 }
   0xd   :  { %195 = shalt.err (!%p192_p4)
}
   0xe   :  { %s221_s17 = smov 128   ;;  %s222_s18 = smov 8  }
   0xf   :  { %23 = dma.hbm_to_vmem [thread:$0]  %s259_s0, 256, %s18_s15, [#allocation4], %s221_s17, %s221_s17, %s222_s18  }
  0x10   :  { %216 = dma.done.wait [#allocation4], 256  }
  0x11   :  { %217 = vsyncadd [#allocation4], 4294967040  ;;  %v32_v1 = vld [vmem:[#allocation3 + $0x8] sm:$0xff]  ;;  %v31_v2 = vld [vmem:[#allocation3] sm:$0xff]  ;;  %v223_v11 = vmov 0.0   ;;  %vm224_vm0 = vmmov 0   ;;  %v63_v25 = vlaneseq }
  0x12   :  { %35 = vadd.xlane.f32.xlu0 %v32_v1  ;;  %157 = vmatprep.subr.mxu0 %v223_v11  ;;  %v57_v12 = vld [vmem:[#allocation2] sm:$0x1]  ;;  %v225_v13 = vmov 0   ;;  %s226_s21 = smov [#allocation6]   ;;  %vm137_vm1 = vcmask 122880  }
  0x13   :  { %161 = vmatprep.mubr.msk.f32.mxu0 %vm224_vm0, %v223_v11  ;;  %171 = vset.pattern.permute.xlu0 %v225_v13  ;;  %v56_v24 = vld [vmem:[%s260_s1] sm:$0x1]  ;;  %v64_v26 = vshrl.u32 %v63_v25, 7  ;;  %s145_s22 = sshll.u32 %s226_s21, 4  ;;  %s146_s22 = int_to_ptr.vmem [resolvable:$true] %s145_s22 }
  0x14   :  { %s196_s23 = scalar_lea.vmem %s146_s22, 16  ;;  %s200_s24 = scalar_lea.vmem %s146_s22, 32 }
  0x15   :  { %v65_v27 = vsub.s32 0, %v64_v26  ;;  %p197_p5 = scmp.ne.s32.totalorder %s146_s22, %s196_s23  ;;  %p201_p6 = scmp.lt.s32.totalorder %s146_s22, %s146_s22 }
  0x16   :  { %33 = vadd.xlane.f32.xlu0 %v31_v2  ;;  %p202_p7 = scmp.lt.s32.totalorder %s200_s24, %s196_s23 }
  0x18   :  { %p203_p8 = por %p202_p7, %p201_p6 }
  0x1a   :  { %p204_p9 = pnand %p203_p8, %p197_p5 }
  0x2c   :  { %60 = vperm.xlu0 %171, %v57_v12  }
  0x9b   :  { %v36_v3 = vpop.xlane.xlu0 %35 }
  0x9c   :  { %v39_v4 = vmul.f32 0.0078125, %v36_v3 }
  0x9e   :  { %v41_v5 = vsub.f32 %v32_v1, %v39_v4 }
  0x9f   :  { %v34_v6 = vpop.xlane.xlu0 %33 }
  0xa0   :  { %v38_v7 = vmul.f32 0.0078125, %v34_v6  ;;  %v43_v8 = vmul.f32 %v41_v5, %v41_v5 }
  0xa2   :  { %v40_v9 = vsub.f32 %v31_v2, %v38_v7  ;;  %46 = vadd.xlane.f32.xlu1 %v43_v8 }
  0xa4   :  { %v42_v10 = vmul.f32 %v40_v9, %v40_v9 }
  0xa6   :  { %44 = vadd.xlane.f32.xlu1 %v42_v10 }
  0xa7   :  { %v61_v28 = vpop.permute.xlu0 %60 }
  0xa8   :  { %v66_v29 = vrot.slane %v61_v28, %v65_v27 }
 0x12b   :  { %v47_v14 = vpop.xlane.xlu1 %46 }
 0x12c   :  { %v49_v15 = vmul.f32 0.0078125, %v47_v14 }
 0x12e   :  { %v51_v16 = vadd.f32 1e-05, %v49_v15 }
 0x12f   :  { %v45_v17 = vpop.xlane.xlu1 %44 }
 0x130   :  { %172 = vrsqrt.f32 %v51_v16  ;;  %v48_v18 = vmul.f32 0.0078125, %v45_v17 }
 0x132   :  { %v50_v19 = vadd.f32 1e-05, %v48_v18 }
 0x134   :  { %174 = vrsqrt.f32 %v50_v19 }
 0x13d   :  { %v173_v20 = vpop.eup %172 }
 0x13e   :  { %v55_v21 = vmul.f32 %v173_v20, %v41_v5 }
 0x140   :  { %158 = vmatpush3.xpose.msra.mxu0 %v55_v21 }
 0x141   :  { %v175_v22 = vpop.eup %174  ;;  %159 = vmatprep.subr.mxu0 %v223_v11 }
 0x142   :  { %v54_v23 = vmul.f32 %v175_v22, %v40_v9 }
 0x144   :  { %160 = vmatpush3.xpose.msra.mxu0 %v54_v23 }
 0x147   :  { %162 = vmatmul.mubr.f32.vlgmr.msra.gmra.mxu0 %v56_v24 }
 0x207   :  { %v133_v30 = vpop.f32.mrf.mxu0 }
 0x208   :  { %v134_v31 = vadd.f32 %v133_v30, %v66_v29 }
 0x209   :  { %v163_v32 = vpop.f32.mrf.mxu0 }
 0x20a   :  { %138 = vst.msk [vmem:[#allocation6] sm:$0x1] %vm137_vm1, %v134_v31 }
 0x20b   :  { %207 = shalt.err (!%p204_p9)
}
 0x20c   :  { %148 = dma.vmem_to_hbm [thread:$0]  %s146_s22, 16, %s262_s3, [#allocation5]  }
 0x20d   :  { %218 = dma.done.wait [#allocation5], 16  }
 0x20e   :  { %219 = vsyncadd [#allocation5], 4294967280 }
 0x20f   :  { %152 = vsyncpa [#allocation4], 1 }
 0x210   :  { %153 = vsyncpa [#allocation5], 1 }

</bundles_post_ra>
